<compile_context>
chip_gen: v7x
topology: tpu7x:2x2x1
jax: 0.10.0
libtpu: 0.0.40
codegen_flags: <defaults>
</compile_context>

<pallas_src>
import functools

import jax
import jax.numpy as jnp
from jax import lax
from jax.experimental import pallas as pl
from jax.experimental.pallas import tpu as pltpu

_LANES = 128
_MIN_ROWS = 16                       # keeps half-tiles sublane (8) aligned
_MIN_ELEMS = _MIN_ROWS * _LANES      # 2048
_BLOCK_ROWS = 1024                   # 1024*128*4B = 512 KiB per tile buffer
_TWO_PI = 6.283185307179586


def _mix32(x):
    """lowbias32 integer hash (murmur3-style finalizer), uint32 -> uint32."""
    x = x ^ lax.shift_right_logical(x, jnp.uint32(16))
    x = x * jnp.uint32(0x7FEB352D)
    x = x ^ lax.shift_right_logical(x, jnp.uint32(15))
    x = x * jnp.uint32(0x846CA68B)
    x = x ^ lax.shift_right_logical(x, jnp.uint32(16))
    return x


def _bits_to_unit(bits):
    """uint32 random bits -> float32 uniform in [0, 1) via exponent bit-trick."""
    mant = lax.shift_right_logical(bits, jnp.uint32(9))
    f = lax.bitcast_convert_type(mant | jnp.uint32(0x3F800000), jnp.float32)
    return f - jnp.float32(1.0)


def _gaussian_noise_kernel(seed_ref, x_ref, o_ref, *, std):
    block_rows = x_ref.shape[0]
    half = block_rows // 2

    # Hash the seed once so per-view consecutive seeds are decorrelated.
    seed = seed_ref[0].astype(jnp.uint32)
    key = _mix32(seed ^ jnp.uint32(0x9E3779B9))

    # Per-element global counters for the top half of this tile; the bottom
    # half reuses the same (u1, u2) pair through the second Box-Muller output,
    # so counters stay unique across tiles (tile i owns rows [i*TR, i*TR+TR)).
    tile_row0 = (pl.program_id(0) * block_rows).astype(jnp.uint32)
    row = lax.broadcasted_iota(jnp.uint32, (half, _LANES), 0)
    col = lax.broadcasted_iota(jnp.uint32, (half, _LANES), 1)
    gidx = (tile_row0 + row) * jnp.uint32(_LANES) + col

    b1 = _mix32(gidx + key)
    b2 = _mix32(gidx ^ (key * jnp.uint32(0x85EBCA6B) + jnp.uint32(0xC2B2AE3D)))

    u1 = _bits_to_unit(b1)                       # [0, 1)
    u2 = _bits_to_unit(b2)                       # [0, 1)

    # Box-Muller; (1 - u1) lies in (0, 1] so log() stays finite.
    r = jnp.sqrt(jnp.float32(-2.0) * jnp.log(jnp.float32(1.0) - u1))
    r = r * jnp.float32(std)
    theta = jnp.float32(_TWO_PI) * u2
    z0 = r * jnp.cos(theta)
    z1 = r * jnp.sin(theta)

    xf = x_ref[...].astype(jnp.float32)
    o_ref[0:half, :] = (xf[0:half, :] + z0).astype(o_ref.dtype)
    o_ref[half:block_rows, :] = (xf[half:block_rows, :] + z1).astype(o_ref.dtype)


def _single_add_gaussian_noise(x, seed, std):
    """Pallas-backed equivalent of single_add_gaussian_noise (training path)."""
    orig_shape = x.shape
    orig_dtype = x.dtype
    n = x.size

    flat = x.reshape(-1)
    pad = (-n) % _MIN_ELEMS
    if pad:
        # TODO(synk): ragged tails could be handled with an in-kernel masked
        # store instead of this (rare) host-side pad/slice round-trip.
        flat = jnp.pad(flat, (0, pad))
    rows = flat.shape[0] // _LANES
    x2d = flat.reshape(rows, _LANES)             # contiguous reshape: no copy

    block_rows = min(_BLOCK_ROWS, rows)          # rows is a multiple of 16
    grid = (pl.cdiv(rows, block_rows),)
    seed_arr = jnp.asarray([seed], dtype=jnp.int32)

    out2d = pl.pallas_call(
        functools.partial(_gaussian_noise_kernel, std=float(std)),
        out_shape=jax.ShapeDtypeStruct((rows, _LANES), orig_dtype),
        grid=grid,
        in_specs=[
            pl.BlockSpec(memory_space=pltpu.MemorySpace.SMEM),      # seed
            pl.BlockSpec((block_rows, _LANES), lambda i: (i, 0)),   # x tile
        ],
        out_specs=pl.BlockSpec((block_rows, _LANES), lambda i: (i, 0)),
        compiler_params=pltpu.CompilerParams(
            dimension_semantics=("parallel",)),
    )(seed_arr, x2d)

    if pad:
        return out2d.reshape(-1)[:n].reshape(orig_shape)
    return out2d.reshape(orig_shape)


class AllViewsGaussianNoise:
    """JAX/Pallas port of AllViewsGaussianNoise (adds gaussian noise to 4 views)."""

    VIEWS = ("LCC", "LMLO", "RCC", "RMLO")

    def __init__(self, gaussian_noise_std, training=True):
        self.gaussian_noise_std = gaussian_noise_std
        self.training = training

    def __call__(self, x, seed=0):
        # Per-view pallas_calls (not a stacked/fused call): stacking the views
        # would add a full extra HBM copy, which dominates this mem-bound op;
        # launch overhead is negligible at realistic image sizes.
        return {
            view: self.single_add_gaussian_noise(x[view], seed=seed + i)
            for i, view in enumerate(self.VIEWS)
        }

    def single_add_gaussian_noise(self, single_view, seed=0):
        if not self.gaussian_noise_std or not self.training:
            return single_view
        return _single_add_gaussian_noise(
            single_view, seed=seed, std=self.gaussian_noise_std)


if __name__ == "__main__":
    key = jax.random.PRNGKey(0)
    keys = jax.random.split(key, 4)
    # NCHW views, small shapes: batch=2, channels=4, spatial=16x16.
    views = {
        "LCC": jax.random.normal(keys[0], (2, 4, 16, 16), dtype=jnp.float32),
        "LMLO": jax.random.normal(keys[1], (2, 4, 16, 16), dtype=jnp.float32),
        "RCC": jax.random.normal(keys[2], (2, 4, 16, 16), dtype=jnp.float32),
        "RMLO": jax.random.normal(keys[3], (2, 4, 16, 16), dtype=jnp.float32),
    }

    module = AllViewsGaussianNoise(gaussian_noise_std=0.01, training=True)
    out = module(views, seed=42)
    jax.tree_util.tree_map(jax.block_until_ready, out)

    # Sanity checks: shapes/dtypes preserved; noise small, nonzero, ~N(0, std).
    for v in AllViewsGaussianNoise.VIEWS:
        assert out[v].shape == views[v].shape
        assert out[v].dtype == views[v].dtype
        diff = out[v] - views[v]
        max_abs = float(jnp.max(jnp.abs(diff)))
        assert 0.0 < max_abs < 0.1, max_abs
        dstd = float(jnp.std(diff))
        assert 0.005 < dstd < 0.02, dstd
        assert abs(float(jnp.mean(diff))) < 0.002

    # Different views get different noise (different per-view seeds).
    n_lcc = out["LCC"] - views["LCC"]
    n_lmlo = out["LMLO"] - views["LMLO"]
    assert float(jnp.max(jnp.abs(n_lcc - n_lmlo))) > 0.0

    # Eval mode / zero std is a passthrough (matches PyTorch semantics).
    eval_module = AllViewsGaussianNoise(gaussian_noise_std=0.01, training=False)
    out_eval = eval_module(views, seed=42)
    for v in AllViewsGaussianNoise.VIEWS:
        assert bool(jnp.all(out_eval[v] == views[v]))

    print("KERNEL_OK")
</pallas_src>

<mosaic_0001>
module attributes {stable_mosaic.version = 11 : i64} {
  func.func @_gaussian_noise_kernel(%arg0: i32, %arg1: memref<1xi32, #tpu.memory_space<smem>>, %arg2: memref<16x128xf32, #tpu.memory_space<vmem>>, %arg3: memref<16x128xf32, #tpu.memory_space<vmem>>) attributes {dimension_semantics = [#tpu.dimension_semantics<parallel>], iteration_bounds = array<i64: 1>, scalar_prefetch = 0 : i64, scratch_operands = 0 : i64, tpu.core_type = #tpu.core_type<tc>, window_params = [{transform_indices = @transform_0, window_bounds = array<i64: 1>}, {transform_indices = @transform_1, window_bounds = array<i64: 16, 128>}, {transform_indices = @transform_2, window_bounds = array<i64: 16, 128>}]} {
    %c0 = arith.constant 0 : index
    %0 = memref.load %arg1[%c0] : memref<1xi32, #tpu.memory_space<smem>>
    %c-1640531527_i32 = arith.constant -1640531527 : i32
    %1 = arith.xori %0, %c-1640531527_i32 : i32
    %c16_i32 = arith.constant 16 : i32
    %2 = arith.shrui %1, %c16_i32 : i32
    %3 = arith.xori %1, %2 : i32
    %c2146121005_i32 = arith.constant 2146121005 : i32
    %4 = arith.muli %3, %c2146121005_i32 : i32
    %c15_i32 = arith.constant 15 : i32
    %5 = arith.shrui %4, %c15_i32 : i32
    %6 = arith.xori %4, %5 : i32
    %c-2073254261_i32 = arith.constant -2073254261 : i32
    %7 = arith.muli %6, %c-2073254261_i32 : i32
    %c16_i32_0 = arith.constant 16 : i32
    %8 = arith.shrui %7, %c16_i32_0 : i32
    %9 = arith.xori %7, %8 : i32
    %c16_i32_1 = arith.constant 16 : i32
    %10 = arith.muli %arg0, %c16_i32_1 : i32
    %11 = tpu.iota {dimensions = array<i32: 0>} : vector<8x128xi32>
    %12 = tpu.iota {dimensions = array<i32: 1>} : vector<8x128xi32>
    %13 = vector.broadcast %10 : i32 to vector<8x128xi32>
    %14 = arith.addi %13, %11 : vector<8x128xi32>
    %c128_i32 = arith.constant 128 : i32
    %15 = vector.broadcast %c128_i32 : i32 to vector<8x128xi32>
    %16 = arith.muli %14, %15 : vector<8x128xi32>
    %17 = arith.addi %16, %12 : vector<8x128xi32>
    %18 = vector.broadcast %9 : i32 to vector<8x128xi32>
    %19 = arith.addi %17, %18 : vector<8x128xi32>
    %c16_i32_2 = arith.constant 16 : i32
    %20 = vector.broadcast %c16_i32_2 : i32 to vector<8x128xi32>
    %21 = arith.shrui %19, %20 : vector<8x128xi32>
    %22 = arith.xori %19, %21 : vector<8x128xi32>
    %c2146121005_i32_3 = arith.constant 2146121005 : i32
    %23 = vector.broadcast %c2146121005_i32_3 : i32 to vector<8x128xi32>
    %24 = arith.muli %22, %23 : vector<8x128xi32>
    %c15_i32_4 = arith.constant 15 : i32
    %25 = vector.broadcast %c15_i32_4 : i32 to vector<8x128xi32>
    %26 = arith.shrui %24, %25 : vector<8x128xi32>
    %27 = arith.xori %24, %26 : vector<8x128xi32>
    %c-2073254261_i32_5 = arith.constant -2073254261 : i32
    %28 = vector.broadcast %c-2073254261_i32_5 : i32 to vector<8x128xi32>
    %29 = arith.muli %27, %28 : vector<8x128xi32>
    %c16_i32_6 = arith.constant 16 : i32
    %30 = vector.broadcast %c16_i32_6 : i32 to vector<8x128xi32>
    %31 = arith.shrui %29, %30 : vector<8x128xi32>
    %32 = arith.xori %29, %31 : vector<8x128xi32>
    %c-2048144789_i32 = arith.constant -2048144789 : i32
    %33 = arith.muli %9, %c-2048144789_i32 : i32
    %c-1028477379_i32 = arith.constant -1028477379 : i32
    %34 = arith.addi %33, %c-1028477379_i32 : i32
    %35 = vector.broadcast %34 : i32 to vector<8x128xi32>
    %36 = arith.xori %17, %35 : vector<8x128xi32>
    %c16_i32_7 = arith.constant 16 : i32
    %37 = vector.broadcast %c16_i32_7 : i32 to vector<8x128xi32>
    %38 = arith.shrui %36, %37 : vector<8x128xi32>
    %39 = arith.xori %36, %38 : vector<8x128xi32>
    %c2146121005_i32_8 = arith.constant 2146121005 : i32
    %40 = vector.broadcast %c2146121005_i32_8 : i32 to vector<8x128xi32>
    %41 = arith.muli %39, %40 : vector<8x128xi32>
    %c15_i32_9 = arith.constant 15 : i32
    %42 = vector.broadcast %c15_i32_9 : i32 to vector<8x128xi32>
    %43 = arith.shrui %41, %42 : vector<8x128xi32>
    %44 = arith.xori %41, %43 : vector<8x128xi32>
    %c-2073254261_i32_10 = arith.constant -2073254261 : i32
    %45 = vector.broadcast %c-2073254261_i32_10 : i32 to vector<8x128xi32>
    %46 = arith.muli %44, %45 : vector<8x128xi32>
    %c16_i32_11 = arith.constant 16 : i32
    %47 = vector.broadcast %c16_i32_11 : i32 to vector<8x128xi32>
    %48 = arith.shrui %46, %47 : vector<8x128xi32>
    %49 = arith.xori %46, %48 : vector<8x128xi32>
    %c9_i32 = arith.constant 9 : i32
    %50 = vector.broadcast %c9_i32 : i32 to vector<8x128xi32>
    %51 = arith.shrui %32, %50 : vector<8x128xi32>
    %c1065353216_i32 = arith.constant 1065353216 : i32
    %52 = vector.broadcast %c1065353216_i32 : i32 to vector<8x128xi32>
    %53 = arith.ori %51, %52 : vector<8x128xi32>
    %54 = tpu.bitcast %53 : vector<8x128xi32> -> vector<8x128xf32>
    %cst = arith.constant 1.000000e+00 : f32
    %55 = vector.broadcast %cst : f32 to vector<8x128xf32>
    %56 = arith.subf %54, %55 : vector<8x128xf32>
    %c9_i32_12 = arith.constant 9 : i32
    %57 = vector.broadcast %c9_i32_12 : i32 to vector<8x128xi32>
    %58 = arith.shrui %49, %57 : vector<8x128xi32>
    %c1065353216_i32_13 = arith.constant 1065353216 : i32
    %59 = vector.broadcast %c1065353216_i32_13 : i32 to vector<8x128xi32>
    %60 = arith.ori %58, %59 : vector<8x128xi32>
    %61 = tpu.bitcast %60 : vector<8x128xi32> -> vector<8x128xf32>
    %cst_14 = arith.constant 1.000000e+00 : f32
    %62 = vector.broadcast %cst_14 : f32 to vector<8x128xf32>
    %63 = arith.subf %61, %62 : vector<8x128xf32>
    %cst_15 = arith.constant 1.000000e+00 : f32
    %64 = vector.broadcast %cst_15 : f32 to vector<8x128xf32>
    %65 = arith.subf %64, %56 : vector<8x128xf32>
    %66 = math.log %65 : vector<8x128xf32>
    %cst_16 = arith.constant -2.000000e+00 : f32
    %67 = vector.broadcast %cst_16 : f32 to vector<8x128xf32>
    %68 = arith.mulf %67, %66 : vector<8x128xf32>
    %69 = math.sqrt %68 : vector<8x128xf32>
    %cst_17 = arith.constant 0.00999999977 : f32
    %70 = vector.broadcast %cst_17 : f32 to vector<8x128xf32>
    %71 = arith.mulf %69, %70 : vector<8x128xf32>
    %cst_18 = arith.constant 6.28318548 : f32
    %72 = vector.broadcast %cst_18 : f32 to vector<8x128xf32>
    %73 = arith.mulf %72, %63 : vector<8x128xf32>
    %74 = math.cos %73 : vector<8x128xf32>
    %75 = arith.mulf %71, %74 : vector<8x128xf32>
    %76 = math.sin %73 : vector<8x128xf32>
    %77 = arith.mulf %71, %76 : vector<8x128xf32>
    %c0_19 = arith.constant 0 : index
    %c0_20 = arith.constant 0 : index
    %78 = vector.load %arg2[%c0_19, %c0_20] : memref<16x128xf32, #tpu.memory_space<vmem>>, vector<16x128xf32>
    %79 = vector.extract_strided_slice %78 {offsets = [0, 0], sizes = [8, 128], strides = [1, 1]} : vector<16x128xf32> to vector<8x128xf32>
    %80 = arith.addf %79, %75 : vector<8x128xf32>
    %c0_21 = arith.constant 0 : index
    %c0_22 = arith.constant 0 : index
    %81 = vector.load %arg3[%c0_21, %c0_22] : memref<16x128xf32, #tpu.memory_space<vmem>>, vector<8x128xf32>
    tpu.vector_store %arg3[%c0_21, %c0_22], %80 {strides = array<i32>} : memref<16x128xf32, #tpu.memory_space<vmem>>, vector<8x128xf32>,
    %82 = vector.extract_strided_slice %78 {offsets = [8, 0], sizes = [8, 128], strides = [1, 1]} : vector<16x128xf32> to vector<8x128xf32>
    %83 = arith.addf %82, %77 : vector<8x128xf32>
    %c8 = arith.constant 8 : index
    %c0_23 = arith.constant 0 : index
    %84 = vector.load %arg3[%c8, %c0_23] : memref<16x128xf32, #tpu.memory_space<vmem>>, vector<8x128xf32>
    tpu.vector_store %arg3[%c8, %c0_23], %83 {strides = array<i32>} : memref<16x128xf32, #tpu.memory_space<vmem>>, vector<8x128xf32>,
    return
  }
  func.func @transform_0(%arg0: i32) -> i32 {
    %c0_i32 = arith.constant 0 : i32
    %c0_i32_0 = arith.constant 0 : i32
    return %c0_i32 : i32
  }
  func.func @transform_1(%arg0: i32) -> (i32, i32) {
    %c0_i32 = arith.constant 0 : i32
    %c0_i32_0 = arith.constant 0 : i32
    return %arg0, %c0_i32 : i32, i32
  }
  func.func @transform_2(%arg0: i32) -> (i32, i32) {
    %c0_i32 = arith.constant 0 : i32
    %c0_i32_0 = arith.constant 0 : i32
    return %arg0, %c0_i32 : i32, i32
  }
}

</mosaic_0001>

<bundles_post_ra>
// kernel: tpu_custom_call.1
= control target key start
LH: loop header
LB: loop body
LE: loop exit
PB: predicated region body
PF: predicated region fallthrough
CT: control target
= control target key end

     0   :  { %8 = vsyncpa [#allocation4], 0  ;;  %s483_s0 = inlined_call_operand.<no memory space> [shape: s32[1], index: 0, kind: input, shape index: {}]   ;;  %s484_s1 = inlined_call_operand.hbm [shape: f32[16,128], index: 1, kind: input, shape index: {}]   ;;  %s485_s2 = inlined_call_operand.hbm [shape: f32[16,128], index: 2, kind: output, shape index: {}]  }
   0x1   :  { %9 = vsyncpa [#allocation5], 0  ;;  %s401_s9 = smov [#allocation3]   ;;  %s353_s13 = scalar_lea.hbm %s484_s1, 256 }
   0x2   :  { %s17_s10 = sshll.u32 %s401_s9, 4  ;;  %p354_p0 = scmp.ne.s32.totalorder %s484_s1, %s353_s13  ;;  %s18_s10 = int_to_ptr.vmem [resolvable:$true] %s17_s10 }
   0x3   :  { %p357_p1 = scmp.lt.u32.totalorder %s353_s13, %s484_s1 }
   0x5   :  { %p359_p2 = pnand %p357_p1, %p354_p0 }
   0x7   :  { %362 = shalt.err (!%p359_p2)
}
   0x8   :  { %s363_s18 = scalar_lea.vmem %s18_s10, 256  ;;  %p368_p4 = scmp.lt.s32.totalorder %s18_s10, %s18_s10 }
   0x9   :  { %p364_p3 = scmp.ne.s32.totalorder %s18_s10, %s363_s18  ;;  %p369_p5 = scmp.lt.s32.totalorder %s363_s18, %s363_s18 }
   0xb   :  { %p370_p6 = por %p369_p5, %p368_p4 }
   0xd   :  { %p371_p7 = pnand %p370_p6, %p364_p3 }
   0xf   :  { %374 = shalt.err (!%p371_p7)
}
  0x10   :  { %s402_s19 = smov 128   ;;  %s403_s20 = smov 8  }
  0x11   :  { %23 = dma.hbm_to_vmem [thread:$0]  %s484_s1, 256, %s18_s10, [#allocation4], %s402_s19, %s402_s19, %s403_s20  }
  0x12   :  { %397 = dma.done.wait [#allocation4], 256  }
  0x13   :  { %398 = vsyncadd [#allocation4], 4294967040  ;;  %s28_s25 = sxor.u32 2654435769, %s483_s0  ;;  %v38_v0 = vlaneseq  ;;  %v404_v38 = vmov 683565275  }
  0x14   :  { %s29_s26 = sshrl.u32 %s28_s25, 16  ;;  %v405_v40 = vmov 2475754826   ;;  %v406_v42 = vmov 2131351028   ;;  %s410_s0 = smov [#allocation6]  }
  0x15   :  { %s30_s27 = sxor.u32 %s29_s26, %s28_s25  ;;  %v39_v1 = vshrl.u32 %v38_v0, 7  ;;  %v41_v2 = vand.u32 127, %v38_v0  ;;  %v407_v45 = vmov 2102212464   ;;  %v408_v47 = vmov 920167782  }
  0x16   :  { %s31_s28 = smul.u32 2146121005, %s30_s27  ;;  %v409_v55 = vmov 1326507024   ;;  %s309_s7 = sshll.u32 %s410_s0, 4  ;;  %s310_s7 = int_to_ptr.vmem [resolvable:$true] %s309_s7 }
  0x17   :  { %v44_v3 = vmul.u32 128, %v39_v1  ;;  %s375_s8 = scalar_lea.vmem %s310_s7, 256  ;;  %p380_p9 = scmp.lt.s32.totalorder %s310_s7, %s310_s7 }
  0x18   :  { %s32_s29 = sshrl.u32 %s31_s28, 15  ;;  %p376_p8 = scmp.ne.s32.totalorder %s310_s7, %s375_s8 }
  0x19   :  { %s33_s30 = sxor.u32 %s32_s29, %s31_s28  ;;  %v45_v4 = vadd.s32 %v44_v3, %v41_v2  ;;  %p381_p10 = scmp.lt.s32.totalorder %s375_s8, %s375_s8 }
  0x1a   :  { %s34_s3 = smul.u32 2221713035, %s33_s30 }
  0x1b   :  { %p382_p11 = por %p381_p10, %p380_p9 }
  0x1c   :  { %s35_s4 = sshrl.u32 %s34_s3, 16 }
  0x1d   :  { %s36_s5 = sxor.u32 %s35_s4, %s34_s3  ;;  %p383_p12 = pnand %p382_p11, %p376_p8 }
  0x1e   :  { %s56_s1 = smul.u32 2246822507, %s36_s5  ;;  %v46_v9 = vstv %s36_s5 }
  0x1f   :  { %v47_v12 = vadd.s32 %v46_v9, %v45_v4 }
  0x20   :  { %s57_s6 = sadd.s32 3266489917, %s56_s1 }
  0x21   :  { %v58_v5 = vstv %s57_s6  ;;  %v48_v15 = vshrl.u32 %v47_v12, 16 }
  0x22   :  { %v59_v6 = vxor.u32 %v58_v5, %v45_v4 }
  0x23   :  { %v49_v18 = vxor.u32 %v48_v15, %v47_v12 }
  0x24   :  { %v60_v7 = vshrl.u32 %v59_v6, 16 }
  0x25   :  { %v50_v21 = vmul.u32 2146121005, %v49_v18 }
  0x26   :  { %v61_v8 = vxor.u32 %v60_v7, %v59_v6 }
  0x27   :  { %v51_v24 = vshrl.u32 %v50_v21, 15 }
  0x28   :  { %v62_v10 = vmul.u32 2146121005, %v61_v8 }
  0x29   :  { %v52_v27 = vxor.u32 %v51_v24, %v50_v21 }
  0x2a   :  { %v63_v11 = vshrl.u32 %v62_v10, 15 }
  0x2b   :  { %v53_v31 = vmul.u32 2221713035, %v52_v27 }
  0x2c   :  { %v64_v13 = vxor.u32 %v63_v11, %v62_v10 }
  0x2d   :  { %v54_v35 = vshrl.u32 %v53_v31, 16 }
  0x2e   :  { %v65_v14 = vmul.u32 2221713035, %v64_v13 }
  0x2f   :  { %v55_v49 = vxor.u32 %v54_v35, %v53_v31 }
  0x30   :  { %v66_v16 = vshrl.u32 %v65_v14, 16 }
  0x31   :  { %v68_v2 = vshrl.u32 %v55_v49, 9 }
  0x32   :  { %v67_v17 = vxor.u32 %v66_v16, %v65_v14 }
  0x33   :  { %v69_v13 = vor.u32 1065353216, %v68_v2 }
  0x34   :  { %v72_v19 = vshrl.u32 %v67_v17, 9 }
  0x35   :  { %v321_v18 = vadd.f32 -1.0, %v69_v13 }
  0x36   :  { %v73_v20 = vor.u32 1065353216, %v72_v19 }
  0x38   :  { %v322_v22 = vadd.f32 -1.0, %v73_v20 }
  0x3a   :  { %v444_v23 = vmul.f32 6.2831855, %v322_v22  ;;  %v76_v22 = vsub.f32 1.0, %v321_v18 }
  0x3c   :  { %v92_v25 = vand.u32 2139095040, %v444_v23  ;;  %v89_v29 = vand.u32 2147483647, %v444_v23  ;;  %345 = vlog2.f32 %v76_v22  ;;  %vm91_vm7 = vcmp.lt.s32.totalorder %v444_v23, 0 }
  0x3e   :  { %v93_v26 = vshrl.u32 %v92_v25, 23  ;;  %v96_v33 = vand.u32 8388607, %v89_v29  ;;  %vm90_vm8 = vcmp.le.f32.partialorder %v89_v29, 0.7853982 }
  0x40   :  { %v323_v28 = vadd.s32 4294967169, %v93_v26  ;;  %v97_v44 = vor.u32 8388608, %v96_v33 }
  0x42   :  { %v99_v30 = vadd.s32 1, %v323_v28  ;;  %v137_v62 = vshll.u32 %v97_v44, 8 }
  0x44   :  { %vm100_vm0 = vcmp.gt.s32.totalorder %v99_v30, 0 }
  0x45   :  { %v101_v32 = vsel %vm100_vm0, %v99_v30, 0 }
  0x46   :  { %v103_v34 = vand.u32 31, %v101_v32  ;;  %v102_v36 = vshrl.u32 %v101_v32, 5  ;;  %v346_v32 = vpop.eup %345 }
  0x48   :  { %v104_v37 = vsub.s32 32, %v103_v34  ;;  %v106_v39 = vshll.u32 %v404_v38, %v103_v34  ;;  %v109_v41 = vshll.u32 %v405_v40, %v103_v34  ;;  %v112_v43 = vshll.u32 %v406_v42, %v103_v34 }
  0x49   :  { %v115_v46 = vshll.u32 %v407_v45, %v103_v34  ;;  %v118_v48 = vshll.u32 %v408_v47, %v103_v34  ;;  %vm121_vm1 = vcmp.lt.s32.totalorder %v102_v36, 1  ;;  %vm124_vm2 = vcmp.lt.s32.totalorder %v102_v36, 4 }
  0x4a   :  { %v107_v50 = vshrl.u32 %v405_v40, %v104_v37  ;;  %v110_v51 = vshrl.u32 %v406_v42, %v104_v37  ;;  %v113_v52 = vshrl.u32 %v407_v45, %v104_v37  ;;  %v105_v53 = vshrl.u32 %v404_v38, %v104_v37 }
  0x4b   :  { %v116_v54 = vshrl.u32 %v408_v47, %v104_v37  ;;  %v119_v56 = vshrl.u32 %v409_v55, %v104_v37  ;;  %vm123_vm3 = vcmp.lt.s32.totalorder %v102_v36, 3  ;;  %vm122_vm4 = vcmp.lt.s32.totalorder %v102_v36, 2 }
  0x4c   :  { %v108_v57 = vor.u32 %v107_v50, %v106_v39  ;;  %v111_v58 = vor.u32 %v110_v51, %v109_v41  ;;  %v114_v59 = vor.u32 %v113_v52, %v112_v43  ;;  %v78_v34 = vmul.f32 0.6931472, %v346_v32 }
  0x4d   :  { %v117_v60 = vor.u32 %v116_v54, %v115_v46  ;;  %v120_v61 = vor.u32 %v119_v56, %v118_v48 }
  0x4e   :  { %v126_v63 = vsel %vm124_vm2, %v114_v59, 2102212464  ;;  %v129_v0 = vsel %vm121_vm1, %v108_v57, %v111_v58  ;;  %v133_v1 = vsel %vm121_vm1, %v111_v58, %v114_v59  ;;  %v125_v5 = vsel %vm121_vm1, %v105_v53, %v108_v57 }
  0x4f   :  { %v130_v3 = vsel %vm124_vm2, %v117_v60, 920167782  ;;  %v134_v4 = vsel %vm124_vm2, %v120_v61, 1326507024  ;;  %v127_v6 = vsel %vm123_vm3, %v111_v58, %v126_v63  ;;  %v79_v40 = vmul.f32 -2.0, %v78_v34 }
  0x50   :  { %v131_v7 = vsel %vm123_vm3, %v114_v59, %v130_v3  ;;  %v135_v8 = vsel %vm123_vm3, %v117_v60, %v134_v4  ;;  %v128_v14 = vsel %vm122_vm4, %v125_v5, %v127_v6  ;;  %vm181_vm1 = vweird.f32 %v444_v23 }
  0x51   :  { %v132_v9 = vsel %vm122_vm4, %v129_v0, %v131_v7  ;;  %v136_v10 = vsel %vm122_vm4, %v133_v1, %v135_v8  ;;  %v144_v17 = vmul.u32 %v137_v62, %v128_v14  ;;  %347 = vrsqrt.f32 %v79_v40 }
  0x52   :  { %v453_v11 = vmul.u32.u64.low %v137_v62, %v136_v10  ;;  %v454_v12 = vmul.u32.u64.high %v137_v62, %v136_v10, %v453_v11  ;;  %v456_v15 = vmul.u32.u64.low %v137_v62, %v132_v9  ;;  %v457_v16 = vmul.u32.u64.high %v137_v62, %v132_v9, %v456_v15  ;;  %v298_v10 = vld [vmem:[#allocation3] sm:$0xff] }
  0x53   :  { %vm82_vm9 = vcmp.eq.f32.partialorder %v79_v40, inf  ;;  %v85_v58 = vand.u32 2147483648, %v79_v40  ;;  %vm84_vm10 = vcmp.eq.f32.partialorder %v79_v40, 0.0 }
  0x54   :  { %vm146_vm5 = vc.u32 %v454_v12, %v456_v15  ;;  %v147_v19 = vadd.s32 1, %v457_v16  ;;  %v145_v35 = vadd.s32 %v456_v15, %v454_v12  ;;  %v299_v12 = vld [vmem:[#allocation3 + $0x8] sm:$0xff] }
  0x56   :  { %v148_v20 = vsel %vm146_vm5, %v147_v19, %v457_v16 }
  0x57   :  { %v149_v21 = vadd.s32 %v148_v20, %v144_v17 }
  0x59   :  { %v150_v24 = vadd.s32 536870912, %v149_v21 }
  0x5b   :  { %v151_v25 = vshrl.u32 %v150_v24, 30  ;;  %v348_v55 = vpop.eup %347 }
  0x5c   :  { %v81_v57 = vmul.f32 %v348_v55, %v79_v40 }
  0x5d   :  { %v152_v26 = vshll.u32 %v151_v25, 30  ;;  %v175_v48 = vsub.s32 4, %v151_v25 }
  0x5e   :  { %v83_v61 = vsel %vm82_vm9, %v79_v40, %v81_v57 }
  0x5f   :  { %v153_v27 = vsub.s32 %v149_v21, %v152_v26  ;;  %v176_v51 = vsel %vm91_vm7, %v175_v48, %v151_v25  ;;  %v86_v63 = vsel %vm84_vm10, %v85_v58, %v83_v61 }
  0x60   :  { %v178_v54 = vsel %vm90_vm8, 0, %v176_v51  ;;  %v87_v2 = vmul.f32 0.01, %v86_v63 }
  0x61   :  { %v155_v28 = vsub.s32 0, %v153_v27  ;;  %v286_v56 = vadd.s32 3, %v178_v54  ;;  %v182_v59 = vand.u32 3, %v178_v54 }
  0x63   :  { %v324_v30 = vmin.u32 %v155_v28, %v153_v27  ;;  %v287_v60 = vand.u32 3, %v286_v56  ;;  %vm187_vm11 = vcmp.eq.s32.totalorder %v182_v59, 2  ;;  %vm184_vm13 = vcmp.eq.s32.totalorder %v182_v59, 0 }
  0x64   :  { %vm183_vm15 = vcmp.lt.s32.totalorder %v182_v59, 2 }
  0x65   :  { %v157_v31 = vclz %v324_v30  ;;  %vm292_vm12 = vcmp.eq.s32.totalorder %v287_v60, 2  ;;  %vm289_vm14 = vcmp.eq.s32.totalorder %v287_v60, 0  ;;  %vm288_vm0 = vcmp.lt.s32.totalorder %v287_v60, 2 }
  0x67   :  { %v325_v33 = vadd.s32 4294967294, %v157_v31 }
  0x69   :  { %vm326_vm6 = vcmp.lt.s32.totalorder %v325_v33, 0 }
  0x6a   :  { %v160_v36 = vsel %vm326_vm6, 0, %v325_v33 }
  0x6b   :  { %v161_v37 = vsub.s32 32, %v160_v36  ;;  %v162_v38 = vshll.u32 %v153_v27, %v160_v36  ;;  %v165_v39 = vsub.s32 4294967266, %v160_v36 }
  0x6d   :  { %v163_v41 = vshrl.u32 %v145_v35, %v161_v37  ;;  %v166_v42 = vadd.s32 127, %v165_v39 }
  0x6f   :  { %v164_v43 = vor.u32 %v163_v41, %v162_v38  ;;  %v167_v44 = vshll.u32 %v166_v42, 23 }
  0x71   :  { %v168_v45 = vor.u32 4788187, %v167_v44  ;;  %v171_v46 = vcvt.s32.f32 %v164_v43 }
  0x73   :  { %v169_v47 = vand.u32 2147483647, %v168_v45 }
  0x75   :  { %v172_v49 = vmul.f32 %v171_v46, %v169_v47 }
  0x77   :  { %v173_v50 = vxor.u32 2147483648, %v172_v49 }
  0x79   :  { %v174_v52 = vsel %vm91_vm7, %v173_v50, %v172_v49 }
  0x7a   :  { %v177_v53 = vsel %vm90_vm8, %v444_v23, %v174_v52 }
  0x7b   :  { %349 = vcosq.f32 %v177_v53 }
  0x7c   :  { %351 = vsinq.f32 %v177_v53 }
  0x85   :  { %v350_v62 = vpop.eup %349 }
  0x86   :  { %v352_v29 = vpop.eup %351  ;;  %v188_v0 = vxor.u32 2147483648, %v350_v62 }
  0x87   :  { %v185_v1 = vxor.u32 2147483648, %v352_v29 }
  0x88   :  { %v189_v3 = vsel %vm187_vm11, %v188_v0, %v352_v29  ;;  %v294_v4 = vsel %vm292_vm12, %v188_v0, %v352_v29 }
  0x89   :  { %v186_v5 = vsel %vm184_vm13, %v350_v62, %v185_v1  ;;  %v291_v6 = vsel %vm289_vm14, %v350_v62, %v185_v1 }
  0x8a   :  { %v190_v7 = vsel %vm183_vm15, %v186_v5, %v189_v3  ;;  %v295_v8 = vsel %vm288_vm0, %v291_v6, %v294_v4 }
  0x8b   :  { %v191_v9 = vsel %vm181_vm1, nan, %v190_v7  ;;  %v296_v11 = vsel %vm181_vm1, nan, %v295_v8 }
  0x8c   :  { %v192_v13 = vmul.f32 %v191_v9, %v87_v2  ;;  %v297_v14 = vmul.f32 %v296_v11, %v87_v2 }
  0x8e   :  { %v300_v15 = vadd.f32 %v298_v10, %v192_v13  ;;  %v302_v16 = vadd.f32 %v299_v12, %v297_v14 }
  0x90   :  { %301 = vst [vmem:[#allocation6] sm:$0xff] %v300_v15  ;;  %303 = vst [vmem:[#allocation6 + $0x8] sm:$0xff] %v302_v16 }
  0x91   :  { %386 = shalt.err (!%p383_p12)
}
  0x92   :  { %s387_s11 = scalar_lea.hbm %s485_s2, 256 }
  0x93   :  { %p388_p13 = scmp.ne.s32.totalorder %s485_s2, %s387_s11  ;;  %p391_p0 = scmp.lt.u32.totalorder %s387_s11, %s485_s2 }
  0x95   :  { %p393_p1 = pnand %p391_p0, %p388_p13 }
  0x97   :  { %396 = shalt.err (!%p393_p1)
}
  0x98   :  { %315 = dma.vmem_to_hbm [thread:$0]  %s310_s7, 256, %s485_s2, [#allocation5], %s402_s19, %s402_s19, %s403_s20  }
  0x99   :  { %399 = dma.done.wait [#allocation5], 256  }
  0x9a   :  { %400 = vsyncadd [#allocation5], 4294967040 }
  0x9b   :  { %319 = vsyncpa [#allocation4], 1 }
  0x9c   :  { %320 = vsyncpa [#allocation5], 1 }

</bundles_post_ra>
